<compile_context>
chip_gen: v7x
topology: tpu7x:2x2x1
jax: 0.10.0
libtpu: 0.0.40
codegen_flags: <defaults>
</compile_context>

<pallas_src>
import functools

import jax
import jax.numpy as jnp
import numpy as np
from jax.experimental import pallas as pl
from jax.experimental.pallas import tpu as pltpu


def _round_up(n, m):
    return ((n + m - 1) // m) * m


# ------------------------------ Pallas kernel ------------------------------ #

def _pool_conv_kernel(p_ref, x_ref, w_ref, b_ref, o_ref, acc_ref, *,
                      p_is_resident):
    """p_ref: pooling weights P^T — full (n_t, hw_tile, oxy) resident array, or
              the current (hw_tile, oxy) tile in the streaming fallback.
    x_ref:  (C, hw_tile) activation tile (NCHW layout, HW flattened).
    w_ref:  (Cout, Cin) 1x1 conv weight.
    b_ref:  (C, 1) conv bias.
    o_ref:  (C, oxy) output tile (resident across the HW reduction axis).
    acc_ref: (C, oxy) f32 VMEM accumulator scratch."""
    t = pl.program_id(1)

    @pl.when(t == 0)
    def _():
        acc_ref[...] = jnp.zeros_like(acc_ref)

    p_tile = p_ref[t] if p_is_resident else p_ref[...]      # (hw_tile, oxy) f32
    # Partial adaptive-average-pool on the MXU: (C, hw_tile) @ (hw_tile, oxy).
    # X may be bf16 (halved HBM traffic); accumulate in f32.
    acc_ref[...] += jnp.dot(x_ref[...].astype(jnp.float32), p_tile,
                            preferred_element_type=jnp.float32)

    @pl.when(t == pl.num_programs(1) - 1)
    def _():
        # 1x1 conv epilogue on the pooled tile: (Cout, Cin) @ (Cin, oxy) + b.
        out = jnp.dot(w_ref[...], acc_ref[...],
                      preferred_element_type=jnp.float32) + b_ref[...]
        o_ref[...] = out.astype(o_ref.dtype)


# --------------------------------- helpers ---------------------------------- #

@functools.lru_cache(maxsize=None)
def _build_pool_matrix_np(H, W, out_x, out_y, hw_tile, n_t):
    """Exact PyTorch AdaptiveAvgPool2d as a transposed, HW-tiled f32 matrix of
    shape (n_t, hw_tile, out_x*out_y); padded HW rows are zero."""
    hw_pad = n_t * hw_tile
    P = np.zeros((hw_pad, out_x * out_y), np.float32)
    for ox in range(out_x):
        hs = (ox * H) // out_x
        he = -(-((ox + 1) * H) // out_x)          # ceil
        for oy in range(out_y):
            ws = (oy * W) // out_y
            we = -(-((oy + 1) * W) // out_y)      # ceil
            val = 1.0 / float((he - hs) * (we - ws))
            for h in range(hs, he):
                P[h * W + ws:h * W + we, ox * out_y + oy] = val
    return P.reshape(n_t, hw_tile, out_x * out_y)


def _pick_hw_tile(HW, cap):
    """Largest multiple of 128 dividing HW (<= cap) when possible, so no padded
    copy of X is needed; otherwise pad (exact — pad pooling weights are 0)."""
    cap = max(128, (cap // 128) * 128)
    if HW % 128 == 0:
        best, t = 128, 128
        while t <= min(cap, HW):
            if HW % t == 0:
                best = t
            t += 128
        return best, HW // best, False
    # TODO(synk): handle the ragged last tile in-kernel (pl.BoundedSlice)
    # instead of materializing a padded copy of X.
    hw_tile = min(cap, _round_up(HW, 128))
    n_t = -(-HW // hw_tile)
    return hw_tile, n_t, True


# --------------------------------- wrapper ---------------------------------- #

def learnable_adaptive_pooling2d(x_nchw, weight, bias, out_x, out_y, *,
                                 hw_tile=1024, p_resident_bytes=8 << 20):
    """Forward of LearnableAdaptivePooling2d.
    x_nchw: (B, C, H, W) f32 or bf16.  weight: (C, C, 1, 1) torch Conv2d layout.
    bias: (C,).  Returns (B, C, out_x, out_y) in x_nchw.dtype."""
    B, C, H, W = x_nchw.shape
    HW = H * W
    oxy = out_x * out_y
    x_itemsize = jnp.dtype(x_nchw.dtype).itemsize

    hw_tile, n_t, need_pad = _pick_hw_tile(HW, hw_tile)
    hw_pad = n_t * hw_tile

    # NCHW -> (B, C, HW): free reshape of a contiguous tensor (no relayout).
    x_flat = x_nchw.reshape(B, C, HW)
    if need_pad:
        x_flat = jnp.pad(x_flat, ((0, 0), (0, 0), (0, hw_pad - HW)))

    pool_t = jnp.asarray(_build_pool_matrix_np(H, W, out_x, out_y,
                                               hw_tile, n_t))       # f32
    w2 = weight[:, :, 0, 0].astype(jnp.float32)                     # (Cout, Cin)
    b2 = bias.reshape(C, 1).astype(jnp.float32)

    # P is DMA'd once per pallas_call (constant index_map) when it fits VMEM.
    p_vmem_bytes = 2 * n_t * hw_tile * _round_up(oxy, 128) * 4
    p_is_resident = p_vmem_bytes <= p_resident_bytes
    if p_is_resident:
        p_spec = pl.BlockSpec((n_t, hw_tile, oxy), lambda b, t: (0, 0, 0))
    else:
        # TODO(synk): streamed P is re-read once per batch element; prefer the
        # separable two-stage pooling for very large HW.
        p_spec = pl.BlockSpec((None, hw_tile, oxy), lambda b, t: (t, 0, 0))

    # Footprint estimate -> explicit scoped-VMEM limit (lets hw_tile exceed the
    # 16/32 MiB defaults; capped safely below v7x's 64 MiB physical VMEM).
    oxy_l = _round_up(oxy, 128)
    c_s = _round_up(C, 8)
    vmem_est = (2 * c_s * hw_tile * x_itemsize                      # X (2 bufs)
                + (p_vmem_bytes if p_is_resident else 2 * hw_tile * oxy_l * 4)
                + 2 * c_s * _round_up(C, 128) * 4                   # weight
                + 2 * c_s * 128 * 4                                 # bias
                + 2 * c_s * oxy_l * x_itemsize                      # output
                + c_s * oxy_l * 4)                                  # accumulator
    vmem_limit = int(min(max(2 * vmem_est, 16 << 20), 48 << 20))

    cost = pl.CostEstimate(
        flops=2 * B * C * HW * oxy + 2 * B * C * C * oxy,
        transcendentals=0,
        bytes_accessed=(B * C * HW * x_itemsize + hw_pad * oxy * 4
                        + C * C * 4 + C * 4 + B * C * oxy * x_itemsize))

    kernel = functools.partial(_pool_conv_kernel, p_is_resident=p_is_resident)

    out_flat = pl.pallas_call(
        kernel,
        out_shape=jax.ShapeDtypeStruct((B, C, oxy), x_nchw.dtype),
        grid_spec=pltpu.PrefetchScalarGridSpec(
            num_scalar_prefetch=0,
            grid=(B, n_t),
            in_specs=[
                p_spec,
                pl.BlockSpec((None, C, hw_tile), lambda b, t: (b, 0, t)),
                pl.BlockSpec((C, C), lambda b, t: (0, 0)),
                pl.BlockSpec((C, 1), lambda b, t: (0, 0)),
            ],
            out_specs=pl.BlockSpec((None, C, oxy), lambda b, t: (b, 0, 0)),
            scratch_shapes=[pltpu.VMEM((C, oxy), jnp.float32)],
        ),
        compiler_params=pltpu.CompilerParams(
            dimension_semantics=("parallel", "arbitrary"),
            vmem_limit_bytes=vmem_limit),
        cost_estimate=cost,
    )(pool_t, x_flat, w2, b2)

    # (B, C, Ox*Oy) -> (B, C, Ox, Oy): free reshape, no transpose.
    return out_flat.reshape(B, C, out_x, out_y)


# --------------------------- pure-JAX reference ----------------------------- #

def ref_forward(x, weight, bias, out_x, out_y):
    """Conv-then-pool, op order matching the PyTorch module."""
    B, C, H, W = x.shape
    w2 = weight[:, :, 0, 0]                                   # (Cout, Cin)
    y = jnp.einsum('bihw,oi->bohw', x, w2) + bias[None, :, None, None]
    rows = []
    for ox in range(out_x):
        hs = (ox * H) // out_x
        he = -(-((ox + 1) * H) // out_x)
        cols = []
        for oy in range(out_y):
            ws = (oy * W) // out_y
            we = -(-((oy + 1) * W) // out_y)
            cols.append(jnp.mean(y[:, :, hs:he, ws:we], axis=(2, 3)))
        rows.append(jnp.stack(cols, axis=-1))                 # (B, C, Oy)
    return jnp.stack(rows, axis=-2)                           # (B, C, Ox, Oy)


# ----------------------------------- main ----------------------------------- #

if __name__ == "__main__":
    key = jax.random.PRNGKey(0)
    kx, kw, kb = jax.random.split(key, 3)

    # Small config: batch=2, channels=4, 16x16 input, 5x7 output
    # (non-divisible bins exercise the adaptive-pooling boundary formula).
    B, C, H, W = 2, 4, 16, 16
    out_x, out_y = 5, 7

    x = jax.random.normal(kx, (B, C, H, W), jnp.float32)
    weight = jax.random.normal(kw, (C, C, 1, 1), jnp.float32) * 0.1
    bias = jax.random.normal(kb, (C,), jnp.float32) * 0.1

    # hw_tile=128 -> 2 reduction steps along HW, exercising the accumulator
    # path and the resident-P dynamic tile indexing.
    out = learnable_adaptive_pooling2d(x, weight, bias, out_x, out_y,
                                       hw_tile=128)
    out = jax.block_until_ready(out)
    assert out.shape == (B, C, out_x, out_y), out.shape

    ref = ref_forward(x, weight, bias, out_x, out_y)
    max_err = float(jnp.max(jnp.abs(out - ref)))
    assert max_err < 1e-4, f"max abs error {max_err}"

    # bf16 activation streaming (halved X HBM bytes, f32 in-kernel accumulate).
    out_bf = learnable_adaptive_pooling2d(x.astype(jnp.bfloat16), weight, bias,
                                          out_x, out_y, hw_tile=128)
    out_bf = jax.block_until_ready(out_bf)
    max_err_bf = float(jnp.max(jnp.abs(out_bf.astype(jnp.float32) - ref)))
    assert max_err_bf < 5e-2, f"bf16 max abs error {max_err_bf}"

    print("KERNEL_OK")
</pallas_src>

<mosaic_0001>
module attributes {stable_mosaic.version = 11 : i64} {
  func.func @_pool_conv_kernel(%arg0: i32, %arg1: i32, %arg2: memref<2x128x35xf32, #tpu.memory_space<vmem>>, %arg3: memref<1x4x128xf32, #tpu.memory_space<vmem>>, %arg4: memref<4x4xf32, #tpu.memory_space<vmem>>, %arg5: memref<4x1xf32, #tpu.memory_space<vmem>>, %arg6: memref<1x4x35xf32, #tpu.memory_space<vmem>>, %arg7: memref<4x35xf32, #tpu.memory_space<vmem>>) attributes {dimension_semantics = [#tpu.dimension_semantics<parallel>, #tpu.dimension_semantics<arbitrary>], iteration_bounds = array<i64: 2, 2>, scalar_prefetch = 0 : i64, scratch_operands = 1 : i64, tpu.core_type = #tpu.core_type<tc>, window_params = [{pipeline_mode = #tpu.pipeline_mode<synchronous>, transform_indices = @transform_0, window_bounds = array<i64: 2, 128, 35>}, {transform_indices = @transform_1, window_bounds = array<i64: 1, 4, 128>}, {pipeline_mode = #tpu.pipeline_mode<synchronous>, transform_indices = @transform_2, window_bounds = array<i64: 4, 4>}, {pipeline_mode = #tpu.pipeline_mode<synchronous>, transform_indices = @transform_3, window_bounds = array<i64: 4, 1>}, {transform_indices = @transform_4, window_bounds = array<i64: 1, 4, 35>}]} {
    %c0_i32 = arith.constant 0 : i32
    %0 = arith.cmpi eq, %arg1, %c0_i32 : i32
    %1 = arith.extui %0 : i1 to i32
    %c0_i32_0 = arith.constant 0 : i32
    %2 = arith.cmpi ne, %1, %c0_i32_0 : i32
    scf.if %2 {
      %cst_10 = arith.constant 0.000000e+00 : f32
      %15 = vector.broadcast %cst_10 : f32 to vector<4x35xf32>
      %c0_11 = arith.constant 0 : index
      %c0_12 = arith.constant 0 : index
      %16 = vector.load %arg7[%c0_11, %c0_12] : memref<4x35xf32, #tpu.memory_space<vmem>>, vector<4x35xf32>
      tpu.vector_store %arg7[%c0_11, %c0_12], %15 {strides = array<i32>} : memref<4x35xf32, #tpu.memory_space<vmem>>, vector<4x35xf32>,
    } else {
    }
    %3 = arith.index_cast %arg1 : i32 to index
    %c0 = arith.constant 0 : index
    %c0_1 = arith.constant 0 : index
    %4 = vector.load %arg2[%3, %c0, %c0_1] : memref<2x128x35xf32, #tpu.memory_space<vmem>>, vector<1x128x35xf32>
    %5 = vector.shape_cast %4 : vector<1x128x35xf32> to vector<128x35xf32>
    %c0_2 = arith.constant 0 : index
    %c0_3 = arith.constant 0 : index
    %6 = vector.load %arg7[%c0_2, %c0_3] : memref<4x35xf32, #tpu.memory_space<vmem>>, vector<4x35xf32>
    %c0_4 = arith.constant 0 : index
    %c0_5 = arith.constant 0 : index
    %c0_6 = arith.constant 0 : index
    %7 = vector.load %arg3[%c0_4, %c0_5, %c0_6] : memref<1x4x128xf32, #tpu.memory_space<vmem>>, vector<1x4x128xf32>
    %8 = vector.shape_cast %7 : vector<1x4x128xf32> to vector<4x128xf32>
    %cst = arith.constant dense<0.000000e+00> : vector<4x35xf32>
    %9 = tpu.matmul %8, %5, %cst {dimension_numbers = #tpu.dot_dimension_numbers<[1], [0], [0], [1], [0, 0, 1, 1], [], []>} : vector<4x128xf32>, vector<128x35xf32>, vector<4x35xf32> -> vector<4x35xf32>
    %10 = arith.addf %6, %9 : vector<4x35xf32>
    %c0_7 = arith.constant 0 : index
    %c0_8 = arith.constant 0 : index
    %11 = vector.load %arg7[%c0_7, %c0_8] : memref<4x35xf32, #tpu.memory_space<vmem>>, vector<4x35xf32>
    tpu.vector_store %arg7[%c0_7, %c0_8], %10 {strides = array<i32>} : memref<4x35xf32, #tpu.memory_space<vmem>>, vector<4x35xf32>,
    %c1_i32 = arith.constant 1 : i32
    %12 = arith.cmpi eq, %arg1, %c1_i32 : i32
    %13 = arith.extui %12 : i1 to i32
    %c0_i32_9 = arith.constant 0 : i32
    %14 = arith.cmpi ne, %13, %c0_i32_9 : i32
    scf.if %14 {
      %c0_10 = arith.constant 0 : index
      %c0_11 = arith.constant 0 : index
      %15 = vector.load %arg4[%c0_10, %c0_11] : memref<4x4xf32, #tpu.memory_space<vmem>>, vector<4x4xf32>
      %c0_12 = arith.constant 0 : index
      %c0_13 = arith.constant 0 : index
      %16 = vector.load %arg7[%c0_12, %c0_13] : memref<4x35xf32, #tpu.memory_space<vmem>>, vector<4x35xf32>
      %cst_14 = arith.constant dense<0.000000e+00> : vector<4x35xf32>
      %17 = tpu.matmul %15, %16, %cst_14 {dimension_numbers = #tpu.dot_dimension_numbers<[1], [0], [0], [1], [0, 0, 1, 1], [], []>} : vector<4x4xf32>, vector<4x35xf32>, vector<4x35xf32> -> vector<4x35xf32>
      %c0_15 = arith.constant 0 : index
      %c0_16 = arith.constant 0 : index
      %18 = vector.load %arg5[%c0_15, %c0_16] : memref<4x1xf32, #tpu.memory_space<vmem>>, vector<4x1xf32>
      %19 = vector.broadcast %18 : vector<4x1xf32> to vector<4x35xf32>
      %20 = arith.addf %17, %19 : vector<4x35xf32>
      %c0_17 = arith.constant 0 : index
      %c0_18 = arith.constant 0 : index
      %c0_19 = arith.constant 0 : index
      %21 = vector.load %arg6[%c0_17, %c0_18, %c0_19] : memref<1x4x35xf32, #tpu.memory_space<vmem>>, vector<1x4x35xf32>
      %22 = vector.shape_cast %21 : vector<1x4x35xf32> to vector<4x35xf32>
      %23 = vector.shape_cast %20 : vector<4x35xf32> to vector<1x4x35xf32>
      tpu.vector_store %arg6[%c0_17, %c0_18, %c0_19], %23 {strides = array<i32>} : memref<1x4x35xf32, #tpu.memory_space<vmem>>, vector<1x4x35xf32>,
    } else {
    }
    return
  }
  func.func @transform_0(%arg0: i32, %arg1: i32) -> (i32, i32, i32) {
    %c0_i32 = arith.constant 0 : i32
    %c0_i32_0 = arith.constant 0 : i32
    %c0_i32_1 = arith.constant 0 : i32
    %c0_i32_2 = arith.constant 0 : i32
    return %c0_i32, %c0_i32_0, %c0_i32_1 : i32, i32, i32
  }
  func.func @transform_1(%arg0: i32, %arg1: i32) -> (i32, i32, i32) {
    %c0_i32 = arith.constant 0 : i32
    %c0_i32_0 = arith.constant 0 : i32
    return %arg0, %c0_i32, %arg1 : i32, i32, i32
  }
  func.func @transform_2(%arg0: i32, %arg1: i32) -> (i32, i32) {
    %c0_i32 = arith.constant 0 : i32
    %c0_i32_0 = arith.constant 0 : i32
    %c0_i32_1 = arith.constant 0 : i32
    return %c0_i32, %c0_i32_0 : i32, i32
  }
  func.func @transform_3(%arg0: i32, %arg1: i32) -> (i32, i32) {
    %c0_i32 = arith.constant 0 : i32
    %c0_i32_0 = arith.constant 0 : i32
    %c0_i32_1 = arith.constant 0 : i32
    return %c0_i32, %c0_i32_0 : i32, i32
  }
  func.func @transform_4(%arg0: i32, %arg1: i32) -> (i32, i32, i32) {
    %c0_i32 = arith.constant 0 : i32
    %c0_i32_0 = arith.constant 0 : i32
    %c0_i32_1 = arith.constant 0 : i32
    return %arg0, %c0_i32, %c0_i32_0 : i32, i32, i32
  }
}

</mosaic_0001>

<bundles_post_ra>
// kernel: tpu_custom_call.1
= control target key start
LH: loop header
LB: loop body
LE: loop exit
PB: predicated region body
PF: predicated region fallthrough
CT: control target
= control target key end

     0   :  { %9 = vsyncpa [#allocation4], 0  ;;  %s983_s0 = inlined_call_operand.vmem [shape: f32[2,128,35], index: 0, kind: input, shape index: {}]   ;;  %s984_s1 = inlined_call_operand.vmem [shape: f32[2,4,256], index: 1, kind: input, shape index: {}]   ;;  %s985_s2 = inlined_call_operand.vmem [shape: f32[4,4], index: 2, kind: input, shape index: {}]   ;;  %s986_s3 = inlined_call_operand.vmem [shape: f32[4,1], index: 3, kind: input, shape index: {}]   ;;  %s987_s4 = inlined_call_operand.hbm [shape: f32[2,4,35], index: 4, kind: output, shape index: {}]  }
   0x1   :  { %11 = vsyncpa [#allocation4 + $0x1], 0  ;;  %s809_s15 = smov 0   ;;  %s811_s16 = smov 0  }
   0x2   :  { %s813_s17 = smov 0   ;;  %s815_s18 = smov 0  }
   0x3   :  { %s817_s19 = smov 0   ;;  %s819_s20 = smov 0  }
   0x4   :  { %s821_s21 = smov 0   ;;  %s823_s22 = smov 0  }
   0x5 LB: > { %s501_s23 = sadd.s32 4294967295, %s774_s22   ;;  %s502_s24 = sadd.s32 4294967294, %s774_s22   ;;  %s774_s22 = sphi %s823_s22, %s17_s22   ;;  %s770_s21 = sphi %s821_s21, %s996_s21   ;;  %s766_s20 = sphi %s819_s20, %s995_s20   ;;  %s762_s19 = sphi %s817_s19, %s994_s19   ;;  %s758_s18 = sphi %s815_s18, %s993_s18   ;;  %s754_s17 = sphi %s813_s17, %s992_s17   ;;  %s750_s16 = sphi %s811_s16, %s991_s16   ;;  %s746_s15 = sphi %s809_s15, %s990_s15  }
   0x6   : > { %s26_s25 = sadd.s32 1, %s766_s20  ;;  %s29_s26 = sadd.s32 1, %s770_s21 }
   0x7   : > { %p27_p0 = scmp.ge.s32.totalorder %s26_s25, 2  ;;  %p137_p1 = scmp.ne.s32.totalorder %s754_s17, %s750_s16 }
   0x8   : > { %p138_p2 = scmp.eq.s32.totalorder %s501_s23, 3  ;;  %p143_p4 = scmp.ne.s32.totalorder %s750_s16, %s746_s15 }
   0x9   : > { %s998_s25 = smov (%p27_p0, %s26_s25), 0  ;;  %s1000_s26 = smov (!%p27_p0, %s29_s26), %s770_s21 }
   0xa   : > { %p858_p3 = por %p138_p2, %p137_p1  ;;  %p31_p5 = scmp.ge.s32.totalorder %s1000_s26, 2 }
   0xb   : > { %p144_p6 = scmp.eq.s32.totalorder %s502_s24, 3  ;;  %p505_p7 = scmp.ge.s32.totalorder %s774_s22, 1 }
   0xc   : > { %p182_p8 = scmp.lt.s32.totalorder %s774_s22, 5  ;;  %s1002_s26 = smov (%p31_p5, %s1000_s26), 0 }
   0xd   : > { %p868_p9 = por %p144_p6, %p143_p4  ;;  %s124_s29 = ssub.s32 %s770_s21, %s1002_s26 }
   0xe   : > { %p183_p10 = pnand %p505_p7, %p182_p8  ;;  %s127_s30 = sadd.s32 1, %s754_s17 }
   0xf   : > { %p125_p11 = scmp.eq.s32.totalorder %s124_s29, 0  ;;  %s208_s6 = sand.u32 (!%p183_p10), 1, %s750_s16  }
  0x10   : > { %186 = sbr.rel (%p183_p10) target bundleno = 530 (0x212), region = 36  ;;  %p211_p12 = scmp.lt.s32.totalorder (!%p183_p10), %s762_s19, 1 }
  0x11   : > { %s876_s5 = scalar_select %p125_p11, %s754_s17, %s127_s30  }
  0x12   : > { %s882_s7 = sshll.u32 (!%p183_p10), %s208_s6, 2  ;;  %p213_p13 = scmp.lt.s32.totalorder (!%p183_p10), %s758_s18, 1 }
  0x13   : > { %s210_s24 = scalar_lea.vmem (!%p183_p10), [#allocation3], %s882_s7  ;;  %p509_p0 = scmp.ne.s32.totalorder (!%p183_p10), %s758_s18, 0 }
  0x17   : > { %s212_s8 = scalar_select %p211_p12, %s762_s19, 1 }
  0x18   : > { %s214_s9 = scalar_select %p213_p13, %s758_s18, 1 }
  0x19   : > { %s507_s10 = sshll.u32 %s212_s8, 1  ;;  %222 = sbr.rel (%p509_p0) target bundleno = 32 (0x20), region = 40  ;;  %vm223_vm0 = vcmask (!%p509_p0), 281600   ;;  %v776_v0 = vmov (!%p509_p0), 0.0  }
  0x1a   : > { %s216_s11 = sadd.s32 %s507_s10, %s214_s9  ;;  %224 = vst.msk [vmem:[#allocation2] sm:$0xf] (!%p509_p0), %vm223_vm0, %v776_v0 }
  0x1b   : > { %s508_s12 = sshll.u32 %s216_s11, 2 }
  0x1c   : > { %s890_s23 = scalar_lea.vmem %s984_s1, %s508_s12 }
  0x20 PF: > { %s510_s29 = sshll.u32 %s758_s18, 7  ;;  %v777_v1 = vmov 0.0|0.0   ;;  %vm778_vm1 = vmmov 0   ;;  %v779_v2 = vmov 0.0   ;;  %v244_v27 = vld [vmem:[%s890_s23] sm:$0xf] }
  0x21   : > { %577 = vmatprep.subr.bf16.mxu0 %v777_v1  ;;  %s898_s9 = scalar_lea.vmem %s983_s0, %s510_s29  ;;  %569 = vmatprep.mubr.msk.f32.mxu0 %vm778_vm1, %v779_v2  ;;  %v243_v28 = vld [vmem:[#allocation2] sm:$0xf]  ;;  %vm316_vm2 = vcmask 281600   ;;  %p511_p1 = scmp.ne.s32.totalorder %s758_s18, 1 }
  0x22   : > { %v227_v3 = vld [vmem:[%s898_s9] sm:$0xff]  ;;  %v228_v4 = vld [vmem:[%s898_s9 + $0x8] sm:$0xff]  ;;  %v229_v5 = vld [vmem:[%s898_s9 + $0x10] sm:$0xff]  ;;  %vm334_vm3 = vcmask (!%p511_p1), 1043456   ;;  %vm330_vm4 = vcmask (!%p511_p1), 31744   ;;  %v780_v33 = vmov (!%p511_p1), 0.0  }
  0x23   : > { %v578_v6 = vpack.c.bf16 %v228_v4, %v227_v3  ;;  %v230_v7 = vld [vmem:[%s898_s9 + $0x18] sm:$0xff]  ;;  %v231_v9 = vld [vmem:[%s898_s9 + $0x20] sm:$0xff]  ;;  %v232_v10 = vld [vmem:[%s898_s9 + $0x28] sm:$0xff]  ;;  %vm781_vm5 = vmmov (!%p511_p1), 0   ;;  %v782_v36 = vmov (!%p511_p1), 0  }
  0x24   : > { %v581_v8 = vpack.c.bf16 %v230_v7, %v229_v5  ;;  %v584_v11 = vpack.c.bf16 %v232_v10, %v231_v9  ;;  %v233_v12 = vld [vmem:[%s898_s9 + $0x30] sm:$0xff]  ;;  %v234_v13 = vld [vmem:[%s898_s9 + $0x38] sm:$0xff]  ;;  %v235_v15 = vld [vmem:[%s898_s9 + $0x40] sm:$0xff]  ;;  %679 = vset.pattern.permute.xlu0 (!%p511_p1), %v782_v36 }
  0x25   : > { %579 = vmatpush3.bf16.msra.mxu0 %v578_v6  ;;  %v587_v14 = vpack.c.bf16 %v234_v13, %v233_v12  ;;  %v236_v16 = vld [vmem:[%s898_s9 + $0x48] sm:$0xff]  ;;  %v237_v18 = vld [vmem:[%s898_s9 + $0x50] sm:$0xff]  ;;  %v238_v19 = vld [vmem:[%s898_s9 + $0x58] sm:$0xff] }
  0x26   : > { %580 = vmatprep.subr.bf16.mxu0 %v777_v1  ;;  %v590_v17 = vpack.c.bf16 %v236_v16, %v235_v15  ;;  %v593_v20 = vpack.c.bf16 %v238_v19, %v237_v18  ;;  %v239_v21 = vld [vmem:[%s898_s9 + $0x60] sm:$0xff]  ;;  %v240_v22 = vld [vmem:[%s898_s9 + $0x68] sm:$0xff]  ;;  %v241_v24 = vld [vmem:[%s898_s9 + $0x70] sm:$0xff] }
  0x27   : > { %v596_v23 = vpack.c.bf16 %v240_v22, %v239_v21  ;;  %v242_v25 = vld [vmem:[%s898_s9 + $0x78] sm:$0xff]  ;;  %v322_v34 = vld [vmem:[%s985_s2] sm:$0xf] (!%p511_p1) }
  0x28   : > { %v599_v26 = vpack.c.bf16 %v242_v25, %v241_v24  ;;  %v324_v35 = vld [vmem:[%s986_s3] sm:$0xf] (!%p511_p1) }
  0x29   : > { %582 = vmatpush3.bf16.msra.mxu0 %v581_v8  ;;  %327 = vperm.xlu0 (!%p511_p1), %679, %v324_v35  }
  0x2a   : > { %583 = vmatprep.subr.bf16.mxu0 %v777_v1 }
  0x2d   : > { %585 = vmatpush3.bf16.msra.mxu0 %v584_v11 }
  0x2e   : > { %586 = vmatprep.subr.bf16.mxu0 %v777_v1 }
  0x31   : > { %588 = vmatpush3.bf16.msra.mxu0 %v587_v14 }
  0x32   : > { %589 = vmatprep.subr.bf16.mxu0 %v777_v1 }
  0x35   : > { %591 = vmatpush3.bf16.msra.mxu0 %v590_v17 }
  0x36   : > { %592 = vmatprep.subr.bf16.mxu0 %v777_v1 }
  0x39   : > { %594 = vmatpush3.bf16.msra.mxu0 %v593_v20 }
  0x3a   : > { %595 = vmatprep.subr.bf16.mxu0 %v777_v1 }
  0x3d   : > { %597 = vmatpush3.bf16.msra.mxu0 %v596_v23 }
  0x3e   : > { %598 = vmatprep.subr.bf16.mxu0 %v777_v1 }
  0x41   : > { %600 = vmatpush3.bf16.msra.mxu0 %v599_v26 }
  0x42   : > { %572 = vmatprep.subr.mxu0 (!%p511_p1), %v780_v33 }
  0x44   : > { %570 = vmatmul.mubr.f32.vlgmr.msra.gmra.mrb[0].mxu0 %v244_v27 }
  0x45   : > { %574 = vmatprep.mubr.msk.f32.mxu0 (!%p511_p1), %vm781_vm5, %v780_v33 }
  0xa8   : > { %v328_v37 = vpop.permute.xlu0 (!%p511_p1), %327 }
 0x114   : > { %321 = sbr.rel (%p511_p1) target bundleno = 506 (0x1fa), region = 44 }
 0x117   : > { %v311_v29 = vpop.f32.mrb[0].mxu0 }
 0x118   : > { %v315_v30 = vadd.f32 %v311_v29, %v243_v28  ;;  %v571_v31 = vpop.f32.mrb[1].mxu0 }
 0x11a   : > { %317 = vst.msk [vmem:[#allocation2] sm:$0xf] %vm316_vm2, %v315_v30 }
 0x121   : > { %v323_v32 = vld [vmem:[#allocation2] sm:$0xf] }
 0x122   : > { %573 = vmatpush3.msk.msra.mxu0 %vm334_vm3, %v323_v32 }
 0x123   : > { %575 = vmatmul.mubr.msk.f32.vlgmr.msra.gmra.mrb[0].mxu0 %vm330_vm4, %v322_v34 }
 0x1f6   : > { %v404_v38 = vpop.f32.mrb[0].mxu0 }
 0x1f7   : > { %v405_v39 = vadd.f32 %v404_v38, %v328_v37  ;;  %v576_v40 = vpop.f32.mrb[1].mxu0 }
 0x1f9   : > { %408 = vst.msk [vmem:[%s210_s24] sm:$0xf] %vm316_vm2, %v405_v39 }
 0x1fa PF: > { %s515_s18 = sshll.u32 %s762_s19, 6  ;;  %s423_s30 = sshll.u32 %s210_s24, 4  ;;  %s424_s30 = int_to_ptr.vmem [resolvable:$true] %s423_s30 }
 0x1fb   : > { %s932_s29 = scalar_lea.hbm %s987_s4, %s515_s18  ;;  %s410_s8 = scalar_lea.sflag [#allocation4], %s208_s6 }
 0x1fc   : > { %s680_s9 = scalar_lea.vmem %s424_s30, 64  ;;  %s783_s10 = smov [#allocation3]  }
 0x1fd   : > { %p681_p2 = scmp.ne.s32.totalorder %s424_s30, %s680_s9  ;;  %s684_s11 = sshll.u32 %s783_s10, 4  ;;  %s685_s11 = int_to_ptr.vmem [resolvable:$false] %s684_s11 }
 0x1fe   : > { %s686_s12 = scalar_lea.vmem %s685_s11, 128  ;;  %p687_p6 = scmp.lt.s32.totalorder %s424_s30, %s685_s11 }
 0x1ff   : > { %p682_p4 = pnand %p681_p2, %p858_p3  ;;  %p688_p7 = scmp.lt.s32.totalorder %s686_s12, %s680_s9 }
 0x201   : > { %p683_p5 = pneg %p682_p4  ;;  %p689_p8 = por %p688_p7, %p687_p6 }
 0x203   : > { %p690_p10 = pnand %p689_p8, %p683_p5 }
 0x205   : > { %693 = shalt.err (!%p690_p10)
}
 0x206   : > { %s694_s19 = scalar_lea.hbm %s932_s29, 64  ;;  %s698_s24 = scalar_lea.hbm %s987_s4, 128 }
 0x207   : > { %p695_p11 = scmp.ne.s32.totalorder %s932_s29, %s694_s19  ;;  %p699_p0 = scmp.lt.u32.totalorder %s932_s29, %s987_s4 }
 0x208   : > { %p700_p1 = scmp.lt.u32.totalorder %s698_s24, %s694_s19  ;;  %p702_p4 = scmp.lt.u32.totalorder %s694_s19, %s932_s29 }
 0x209   : > { %p696_p12 = pnand %p695_p11, %p858_p3 }
 0x20a   : > { %p701_p2 = por %p700_p1, %p699_p0 }
 0x20b   : > { %p697_p13 = pneg %p696_p12 }
 0x20c   : > { %p703_p5 = por %p702_p4, %p701_p2 }
 0x20e   : > { %p704_p6 = pnand %p703_p5, %p697_p13 }
 0x210   : > { %707 = shalt.err (!%p704_p6)
}
 0x211   : > { %601 = dma.vmem_to_hbm [thread:$0]  (%p858_p3), %s424_s30, 64, %s932_s29, %s410_s8  }
 0x212 PF: > { %p607_p7 = scmp.ge.s32.totalorder %s774_s22, 2  ;;  %s435_s14 = sand.u32 1, %s746_s15  }
 0x213   : > { %s436_s23 = scalar_lea.sflag [#allocation4], %s435_s14 }
 0x214   : > { %p604_p8 = pnand %p607_p7, %p868_p9 }
 0x216   : > { %741 = dma.done.wait (!%p604_p8), %s436_s23, 64  }
 0x217   : > { %743 = vsyncadd (!%p604_p8), %s436_s23, 4294967232  ;;  %s17_s22 = sadd.s32 1, %s774_s22   ;;  %s990_s15 = smov %s750_s16 }
 0x218   : > { %p14_p10 = scmp.ge.s32.totalorder %s17_s22, 6   ;;  %s991_s16 = smov %s754_s17 }
 0x219   : > { %s992_s17 = smov %s876_s5  ;;  %s993_s18 = smov %s766_s20 }
 0x21a   : > { %s994_s19 = smov %s770_s21  ;;  %s995_s20 = smov %s998_s25 }
 0x21b   : > { %s996_s21 = smov %s1002_s26  ;;  %16 = sbr.rel (!%p14_p10) target bundleno = 5 (0x5), region = 80 }
 0x222   :  { %441 = vsyncpa [#allocation4], 1 }
 0x223   :  { %443 = vsyncpa [#allocation4 + $0x1], 1 }

</bundles_post_ra>
